<compile_context>
chip_gen: v5e
topology: v5e:2x2
jax: 0.10.0
libtpu: 0.0.40
codegen_flags: <defaults>
</compile_context>

<pallas_src>
import jax
import jax.numpy as jnp
from jax.experimental import pallas as pl
from jax.experimental.pallas import tpu as pltpu


def _fwa_affine_kernel(scale_ref, shift_ref, x_ref, o_ref):
    # scale_ref / shift_ref: VMEM (TR, 1) per-row scalars
    # x_ref / o_ref:         VMEM (TR, TS) lane-dense block of the (B*C, H*W) view
    x = x_ref[...].astype(scale_ref.dtype)
    o_ref[...] = (x * scale_ref[...] + shift_ref[...]).astype(o_ref.dtype)


def _fwa_shift_kernel(shift_ref, x_ref, o_ref):
    x = x_ref[...].astype(shift_ref.dtype)
    o_ref[...] = (x + shift_ref[...]).astype(o_ref.dtype)


def _pick_tiles(R, S, itemsize, budget_bytes=6 << 20):
    # Lane axis (TS): largest divisor of S that is a multiple of 128 (or S itself),
    # such that a minimal-row block fits the per-block budget.
    # Row axis (TR): largest divisor of R that is a multiple of 8 (or R itself),
    # such that (TR, TS) fits the budget.  Budget ~6 MiB -> double-buffered
    # in+out ~24 MiB, safely under the 32 MiB scoped VMEM on all generations.
    ts_cands = [d for d in range(S, 0, -1) if S % d == 0 and (d % 128 == 0 or d == S)]
    tr_cands = [d for d in range(R, 0, -1) if R % d == 0 and (d % 8 == 0 or d == R)]
    min_tr = tr_cands[-1]
    ts = next((d for d in ts_cands if min_tr * d * itemsize <= budget_bytes), ts_cands[-1])
    tr = next((d for d in tr_cands if d * ts * itemsize <= budget_bytes), min_tr)
    return tr, ts


def feature_wise_affine(x, noise_embed, weight, bias, use_affine_level=False):
    """Pallas equivalent of FeatureWiseAffine.forward.

    x:           (B, C, H, W)   NCHW, as in PyTorch
    noise_embed: (B, D_in)
    weight:      (C_out, D_in)  PyTorch nn.Linear layout (C_out = C or 2C)
    bias:        (C_out,)
    """
    B, C, H, W = x.shape
    R, S = B * C, H * W

    # --- tiny Linear (negligible HBM traffic) -> per-(batch*channel) scalars ---
    lin = (noise_embed.astype(jnp.float32) @ weight.astype(jnp.float32).T
           + bias.astype(jnp.float32))                       # (B, C) or (B, 2C)

    # Compute dtype: bf16 in / bf16 math (v6e/v7x have bf16 VPU); f32 otherwise.
    compute_dtype = jnp.bfloat16 if x.dtype == jnp.bfloat16 else jnp.float32

    if use_affine_level:
        scale = (1.0 + lin[:, :C]).reshape(R, 1).astype(compute_dtype)   # 1 + gamma
        shift = lin[:, C:].reshape(R, 1).astype(compute_dtype)           # beta
    else:
        scale = None
        shift = lin.reshape(R, 1).astype(compute_dtype)

    # --- lane-dense view and tiling ---
    x2 = x.reshape(R, S)
    TR, TS = _pick_tiles(R, S, x.dtype.itemsize)
    grid = (R // TR, S // TS)

    x_spec = pl.BlockSpec((TR, TS), lambda r, s: (r, s))
    vec_spec = pl.BlockSpec((TR, 1), lambda r, s: (r, 0))
    params = pltpu.CompilerParams(
        dimension_semantics=("parallel", "parallel"),
        vmem_limit_bytes=32 * 1024 * 1024)

    if use_affine_level:
        out2 = pl.pallas_call(
            _fwa_affine_kernel,
            out_shape=jax.ShapeDtypeStruct((R, S), x.dtype),
            grid=grid,
            in_specs=[vec_spec, vec_spec, x_spec],
            out_specs=x_spec,
            compiler_params=params,
        )(scale, shift, x2)
    else:
        out2 = pl.pallas_call(
            _fwa_shift_kernel,
            out_shape=jax.ShapeDtypeStruct((R, S), x.dtype),
            grid=grid,
            in_specs=[vec_spec, x_spec],
            out_specs=x_spec,
            compiler_params=params,
        )(shift, x2)

    return out2.reshape(B, C, H, W)


def _reference(x, noise_embed, weight, bias, use_affine_level):
    # Pure-JAX reference matching the PyTorch module exactly.
    C = x.shape[1]
    lin = noise_embed @ weight.T + bias
    if use_affine_level:
        gamma = lin[:, :C][:, :, None, None]
        beta = lin[:, C:][:, :, None, None]
        return (1.0 + gamma) * x + beta
    return x + lin[:, :, None, None]


if __name__ == "__main__":
    key = jax.random.PRNGKey(0)
    kx, kn, kw1, kb1, kw2, kb2 = jax.random.split(key, 6)

    B, C, H, W = 2, 4, 16, 16
    D_IN = 32

    x = jax.random.normal(kx, (B, C, H, W), jnp.float32)
    noise_embed = jax.random.normal(kn, (B, D_IN), jnp.float32)

    # Deterministic nn.Linear-style parameters (uniform +/- 1/sqrt(fan_in)).
    bound = 1.0 / (D_IN ** 0.5)
    w_plain = jax.random.uniform(kw1, (C, D_IN), jnp.float32, -bound, bound)      # Linear(D_IN, C)
    b_plain = jax.random.uniform(kb1, (C,), jnp.float32, -bound, bound)
    w_aff = jax.random.uniform(kw2, (2 * C, D_IN), jnp.float32, -bound, bound)    # Linear(D_IN, 2C)
    b_aff = jax.random.uniform(kb2, (2 * C,), jnp.float32, -bound, bound)

    # use_affine_level=False : x + noise_func(noise_embed)[..., None, None]
    out0 = jax.block_until_ready(
        feature_wise_affine(x, noise_embed, w_plain, b_plain, use_affine_level=False))
    ref0 = jax.block_until_ready(_reference(x, noise_embed, w_plain, b_plain, False))
    assert out0.shape == (B, C, H, W), out0.shape
    err0 = float(jnp.max(jnp.abs(out0 - ref0)))
    assert jnp.allclose(out0, ref0, atol=1e-5, rtol=1e-5), err0

    # use_affine_level=True : (1 + gamma) * x + beta
    out1 = jax.block_until_ready(
        feature_wise_affine(x, noise_embed, w_aff, b_aff, use_affine_level=True))
    ref1 = jax.block_until_ready(_reference(x, noise_embed, w_aff, b_aff, True))
    err1 = float(jnp.max(jnp.abs(out1 - ref1)))
    assert jnp.allclose(out1, ref1, atol=1e-5, rtol=1e-5), err1

    print("KERNEL_OK")
</pallas_src>

<mosaic_0001>
module attributes {stable_mosaic.version = 11 : i64} {
  func.func @_fwa_shift_kernel(%arg0: i32, %arg1: i32, %arg2: memref<8x1xf32, #tpu.memory_space<vmem>>, %arg3: memref<8x256xf32, #tpu.memory_space<vmem>>, %arg4: memref<8x256xf32, #tpu.memory_space<vmem>>) attributes {dimension_semantics = [#tpu.dimension_semantics<parallel>, #tpu.dimension_semantics<parallel>], iteration_bounds = array<i64: 1, 1>, scalar_prefetch = 0 : i64, scratch_operands = 0 : i64, tpu.core_type = #tpu.core_type<tc>, window_params = [{transform_indices = @transform_0, window_bounds = array<i64: 8, 1>}, {transform_indices = @transform_1, window_bounds = array<i64: 8, 256>}, {transform_indices = @transform_2, window_bounds = array<i64: 8, 256>}]} {
    %c0 = arith.constant 0 : index
    %c0_0 = arith.constant 0 : index
    %0 = vector.load %arg3[%c0, %c0_0] : memref<8x256xf32, #tpu.memory_space<vmem>>, vector<8x256xf32>
    %c0_1 = arith.constant 0 : index
    %c0_2 = arith.constant 0 : index
    %1 = vector.load %arg2[%c0_1, %c0_2] : memref<8x1xf32, #tpu.memory_space<vmem>>, vector<8x1xf32>
    %2 = vector.broadcast %1 : vector<8x1xf32> to vector<8x256xf32>
    %3 = arith.addf %0, %2 : vector<8x256xf32>
    %c0_3 = arith.constant 0 : index
    %c0_4 = arith.constant 0 : index
    %4 = vector.load %arg4[%c0_3, %c0_4] : memref<8x256xf32, #tpu.memory_space<vmem>>, vector<8x256xf32>
    tpu.vector_store %arg4[%c0_3, %c0_4], %3 {strides = array<i32>} : memref<8x256xf32, #tpu.memory_space<vmem>>, vector<8x256xf32>,
    return
  }
  func.func @transform_0(%arg0: i32, %arg1: i32) -> (i32, i32) {
    %c0_i32 = arith.constant 0 : i32
    %c0_i32_0 = arith.constant 0 : i32
    return %arg0, %c0_i32 : i32, i32
  }
  func.func @transform_1(%arg0: i32, %arg1: i32) -> (i32, i32) {
    %c0_i32 = arith.constant 0 : i32
    return %arg0, %arg1 : i32, i32
  }
  func.func @transform_2(%arg0: i32, %arg1: i32) -> (i32, i32) {
    %c0_i32 = arith.constant 0 : i32
    return %arg0, %arg1 : i32, i32
  }
}

</mosaic_0001>

<bundles_post_ra>
// kernel: tpu_custom_call.1
= control target key start
LH: loop header
LB: loop body
LE: loop exit
PB: predicated region body
PF: predicated region fallthrough
CT: control target
= control target key end

     0   :  { %7 = vsyncpa [#allocation3], 0  ;;  %s138_s0 = inlined_call_operand.vmem [shape: f32[8,1], index: 0, kind: input, shape index: {}]   ;;  %s139_s1 = inlined_call_operand.hbm [shape: f32[8,256], index: 1, kind: input, shape index: {}]   ;;  %s140_s2 = inlined_call_operand.hbm [shape: f32[8,256], index: 2, kind: output, shape index: {}]  }
   0x1   :  { %8 = vsyncpa [#allocation4], 0  ;;  %s16_s11 = sshll.u32 %s139_s1, 4  ;;  %s111_s12 = smov [#allocation2]   ;;  %s17_s11 = int_to_ptr.hbm [resolvable:$true] %s16_s11 }
   0x2   :  { %s18_s13 = sshll.u32 %s111_s12, 4  ;;  %s19_s13 = int_to_ptr.vmem [resolvable:$true] %s18_s13 }
   0x3   :  { %21 = dma.hbm_to_vmem [thread:$0]  %s17_s11, 256, %s19_s13, [#allocation3]  }
   0x4   :  { %107 = dma.done.wait [#allocation3], 256  }
   0x5   :  { %108 = vsyncadd [#allocation3], 4294967040  ;;  %v112_v0 = vmov 0   ;;  %v28_v1 = vld [vmem:[%s138_s0] sm:$0xff]  ;;  %v27_v3 = vld [vmem:[#allocation2 + $0x8] sm:$0xff]  ;;  %s113_s16 = smov [#allocation5]  }
   0x6   :  { %58 = vset.pattern.permute.xlu0 %v112_v0  ;;  %v26_v2 = vld [vmem:[#allocation2] sm:$0xff]  ;;  %s43_s17 = sshll.u32 %s113_s16, 4  ;;  %s45_s19 = sshll.u32 %s140_s2, 4  ;;  %s44_s17 = int_to_ptr.vmem [resolvable:$true] %s43_s17  ;;  %s46_s19 = int_to_ptr.hbm [resolvable:$true] %s45_s19 }
   0x7   :  { %31 = vperm.xlu0 %58, %v28_v1  }
  0x79   :  { %v32_v4 = vpop.permute.xlu0 %31 }
  0x7a   :  { %v34_v5 = vadd.f32 %v32_v4, %v26_v2  ;;  %v35_v6 = vadd.f32 %v32_v4, %v27_v3 }
  0x7c   :  { %36 = vst [vmem:[#allocation5] sm:$0xff] %v34_v5 }
  0x7d   :  { %37 = vst [vmem:[#allocation5 + $0x8] sm:$0xff] %v35_v6 }
  0x7e   :  { %48 = dma.vmem_to_hbm [thread:$0]  %s44_s17, 256, %s46_s19, [#allocation4]  }
  0x7f   :  { %109 = dma.done.wait [#allocation4], 256  }
  0x80   :  { %110 = vsyncadd [#allocation4], 4294967040 }
  0x81   :  { %53 = vsyncpa [#allocation3], 1 }
  0x82   :  { %54 = vsyncpa [#allocation4], 1 }

</bundles_post_ra>
